<compile_context>
chip_gen: v5e
topology: v5e:2x2
jax: 0.10.0
libtpu: 0.0.40
codegen_flags: <defaults>
</compile_context>

<pallas_src>
import numpy as np
import jax
import jax.numpy as jnp
from jax.experimental import pallas as pl
from jax.experimental.pallas import tpu as pltpu

C_1 = 0.001
C_2 = 0.008
M = 1000


def _alpha_bar(j):
    return np.sin(0.5 * np.pi * j / M / (C_2 + 1)) ** 2


def make_u():
    """Replicates the u-table construction from iDDPMPrecond.__init__ (float32)."""
    u = np.zeros(M + 1, dtype=np.float32)
    for j in range(M, 0, -1):
        ratio = max(_alpha_bar(j - 1) / _alpha_bar(j), C_1)
        u[j - 1] = np.sqrt((u[j] ** 2 + 1.0) / ratio - 1.0)
    return u


def iddpm_kernel(x_ref, w_ref, beff_ref, o_ref):
    """One grid step = one (batch-group, lane-chunk) tile of the (B*C, H*W) slab.

    x_ref    : VMEM (R, TN) f32   R = bt*C rows (bt batches packed per tile)
    w_ref    : VMEM (R, R)  f32   block-diag per-batch effective weights
                                  (= c_out*c_in*W for each batch in the group)
    beff_ref : VMEM (R, 1)  f32   per-row effective bias c_out*(b + v*c_noise/M)
    o_ref    : VMEM (R, TN) f32

    Computes  D = x + W_eff @ x + b_eff  entirely on the VPU: the channel mix
    is unrolled as R outer-product MACs (a K=R<=8 matmul would leave the MXU
    <1% utilized and pay push/pop latency).  One full-block, lane-dense store.
    """
    x = x_ref[...]                              # (R, TN)
    w = w_ref[...]                              # (R, R)
    r = w.shape[0]
    acc = w[:, 0:1] * x[0:1, :]
    for k in range(1, r):
        acc = acc + w[:, k:k + 1] * x[k:k + 1, :]
    o_ref[...] = x + acc + beff_ref[...]


def _pick_bt(b, c):
    """Smallest batches-per-tile dividing B with bt*C a multiple of 8 (full
    8-sublane vregs); fall back to all batches in one row-block (full extent,
    which is always a legal block shape)."""
    for bt in range(1, b + 1):
        if b % bt == 0 and (bt * c) % 8 == 0:
            return bt
    return b


def _pick_tn(hw, rows, groups, budget_bytes=8 << 20):
    """Largest lane tile (multiple of 128 dividing HW) such that the total
    double-buffered live VMEM of the x and out blocks stays under budget
    (conservative vs v5e's 16 MiB default scoped VMEM / v7x's 64 MiB), while
    keeping >= 2 grid steps whenever possible so both v7x TensorCores get work.
    """
    if hw % 128 != 0:
        # Full-extent fallback (legal block); pipelining across lanes disabled.
        return hw
    per_tn_bytes = rows * 4 * 2 * 2          # (x + out) x double-buffered, f32
    cap = max(128, (budget_bytes // per_tn_bytes) // 128 * 128)
    candidates = [tn for tn in range(128, hw + 1, 128)
                  if hw % tn == 0 and tn <= cap]
    if not candidates:
        return 128
    if groups >= 2:
        return max(candidates)
    multi = [tn for tn in candidates if hw // tn >= 2]
    return max(multi) if multi else max(candidates)


@jax.jit
def iddpm_precond(x_nchw, sigma, w, bias, v, u):
    """JAX wrapper mirroring iDDPMPrecond.forward (fp32 path)."""
    B, C, H, W = x_nchw.shape
    HW = H * W

    # NCHW -> (B*C, H*W): a free contiguous view, no transpose passes.
    x2 = x_nchw.astype(jnp.float32).reshape(B * C, HW)

    # handle_sigma: scalar / (1,) / (B,) -> per-batch sigma.
    sigma = jnp.asarray(sigma, jnp.float32)
    sigma = jnp.broadcast_to(jnp.atleast_1d(sigma), (B,))

    # Per-batch preconditioning scalars (hoisted out of the kernel).
    c_in = 1.0 / jnp.sqrt(sigma * sigma + 1.0)
    c_out = -sigma
    idx = jnp.argmin(jnp.abs(sigma[:, None] - u[None, :].astype(jnp.float32)), axis=1)
    c_noise = jnp.float32(M - 1) - idx.astype(jnp.float32)

    # Fold c_in / c_out into tiny (B*C*C-element) per-batch effective params:
    #   D = x + c_out*(W @ (c_in*x) + b + v*c_noise/M)
    #     = x + (c_out*c_in)*(W @ x) + c_out*(b + v*c_noise/M)
    w_b = (c_out * c_in)[:, None, None] * w[None, :, :]                 # (B, C, C)
    beff = c_out[:, None] * (bias[:, 0][None, :]
                             + v[:, 0][None, :] * (c_noise[:, None] / M))  # (B, C)

    bt = _pick_bt(B, C)          # batches packed per tile (8-sublane packing)
    R = bt * C                   # rows per tile
    G = B // bt                  # batch-group grid extent

    # Block-diagonal effective weights per batch group: (G*R, R).
    wg = w_b.reshape(G, bt, C, C)
    eye = jnp.eye(bt, dtype=jnp.float32)
    weff = jnp.einsum("ij,gioc->giojc", eye, wg).reshape(G * R, R)
    beff2 = beff.reshape(G * R, 1)

    tn = _pick_tn(HW, R, G)
    grid = (G, HW // tn)

    out = pl.pallas_call(
        iddpm_kernel,
        out_shape=jax.ShapeDtypeStruct((B * C, HW), jnp.float32),
        grid_spec=pltpu.PrefetchScalarGridSpec(
            num_scalar_prefetch=0,
            grid=grid,
            in_specs=[
                pl.BlockSpec((R, tn), lambda i, j: (i, j)),   # x slab
                pl.BlockSpec((R, R), lambda i, j: (i, 0)),    # W_eff (per group)
                pl.BlockSpec((R, 1), lambda i, j: (i, 0)),    # b_eff (per group)
            ],
            out_specs=pl.BlockSpec((R, tn), lambda i, j: (i, j)),
        ),
        compiler_params=pltpu.CompilerParams(
            dimension_semantics=("parallel", "parallel")),
    )(x2, weff, beff2)

    return out.reshape(B, C, H, W)


def iddpm_ref(x_nchw, sigma, w, bias, v, u):
    """Pure-JAX reference of the same forward semantics (un-folded form)."""
    B, C, H, W = x_nchw.shape
    x = x_nchw.astype(jnp.float32)
    sigma = jnp.broadcast_to(jnp.atleast_1d(jnp.asarray(sigma, jnp.float32)), (B,))
    c_in = 1.0 / jnp.sqrt(sigma ** 2 + 1.0)
    c_out = -sigma
    idx = jnp.argmin(jnp.abs(sigma[:, None] - u[None, :]), axis=1)
    c_noise = (M - 1) - idx.astype(jnp.float32)
    x_flat = (c_in[:, None, None, None] * x).reshape(B, C, H * W)
    f = (jnp.einsum("oc,bcs->bos", w, x_flat)
         + bias[None]
         + v[None] * (c_noise[:, None, None] / M))
    f = f.reshape(B, C, H, W)
    return x + c_out[:, None, None, None] * f


if __name__ == "__main__":
    key = jax.random.PRNGKey(0)
    k1, k2, k3, k4 = jax.random.split(key, 4)

    B, C, H, W = 2, 4, 16, 16
    x = jax.random.normal(k1, (B, C, H, W), jnp.float32)
    sigma = jnp.array([0.5, 2.3], jnp.float32)        # per-batch noise levels

    # Deterministic synthetic F_theta parameters.
    w = 0.1 * jax.random.normal(k2, (C, C), jnp.float32)
    bias = 0.1 * jax.random.normal(k3, (C, 1), jnp.float32)
    v = 0.1 * jax.random.normal(k4, (C, 1), jnp.float32)

    u = jnp.asarray(make_u())

    out = iddpm_precond(x, sigma, w, bias, v, u)
    out = jax.block_until_ready(out)

    ref = iddpm_ref(x, sigma, w, bias, v, u)
    assert out.shape == (B, C, H, W) and out.dtype == jnp.float32
    assert jnp.allclose(out, ref, atol=1e-5, rtol=1e-5)
    print("KERNEL_OK")
</pallas_src>

<mosaic_0001>
module attributes {stable_mosaic.version = 11 : i64} {
  func.func @iddpm_kernel(%arg0: i32, %arg1: i32, %arg2: memref<8x128xf32, #tpu.memory_space<vmem>>, %arg3: memref<8x8xf32, #tpu.memory_space<vmem>>, %arg4: memref<8x1xf32, #tpu.memory_space<vmem>>, %arg5: memref<8x128xf32, #tpu.memory_space<vmem>>) attributes {dimension_semantics = [#tpu.dimension_semantics<parallel>, #tpu.dimension_semantics<parallel>], iteration_bounds = array<i64: 1, 2>, scalar_prefetch = 0 : i64, scratch_operands = 0 : i64, tpu.core_type = #tpu.core_type<tc>, window_params = [{transform_indices = @transform_0, window_bounds = array<i64: 8, 128>}, {transform_indices = @transform_1, window_bounds = array<i64: 8, 8>}, {transform_indices = @transform_2, window_bounds = array<i64: 8, 1>}, {transform_indices = @transform_3, window_bounds = array<i64: 8, 128>}]} {
    %c0 = arith.constant 0 : index
    %c0_0 = arith.constant 0 : index
    %0 = vector.load %arg2[%c0, %c0_0] : memref<8x128xf32, #tpu.memory_space<vmem>>, vector<8x128xf32>
    %c0_1 = arith.constant 0 : index
    %c0_2 = arith.constant 0 : index
    %1 = vector.load %arg3[%c0_1, %c0_2] : memref<8x8xf32, #tpu.memory_space<vmem>>, vector<8x8xf32>
    %2 = vector.extract_strided_slice %1 {offsets = [0, 0], sizes = [8, 1], strides = [1, 1]} : vector<8x8xf32> to vector<8x1xf32>
    %3 = vector.extract_strided_slice %0 {offsets = [0, 0], sizes = [1, 128], strides = [1, 1]} : vector<8x128xf32> to vector<1x128xf32>
    %4 = vector.broadcast %2 : vector<8x1xf32> to vector<8x128xf32>
    %5 = vector.broadcast %3 : vector<1x128xf32> to vector<8x128xf32>
    %6 = arith.mulf %4, %5 : vector<8x128xf32>
    %7 = vector.extract_strided_slice %1 {offsets = [0, 1], sizes = [8, 1], strides = [1, 1]} : vector<8x8xf32> to vector<8x1xf32>
    %8 = vector.extract_strided_slice %0 {offsets = [1, 0], sizes = [1, 128], strides = [1, 1]} : vector<8x128xf32> to vector<1x128xf32>
    %9 = vector.broadcast %7 : vector<8x1xf32> to vector<8x128xf32>
    %10 = vector.broadcast %8 : vector<1x128xf32> to vector<8x128xf32>
    %11 = arith.mulf %9, %10 : vector<8x128xf32>
    %12 = arith.addf %6, %11 : vector<8x128xf32>
    %13 = vector.extract_strided_slice %1 {offsets = [0, 2], sizes = [8, 1], strides = [1, 1]} : vector<8x8xf32> to vector<8x1xf32>
    %14 = vector.extract_strided_slice %0 {offsets = [2, 0], sizes = [1, 128], strides = [1, 1]} : vector<8x128xf32> to vector<1x128xf32>
    %15 = vector.broadcast %13 : vector<8x1xf32> to vector<8x128xf32>
    %16 = vector.broadcast %14 : vector<1x128xf32> to vector<8x128xf32>
    %17 = arith.mulf %15, %16 : vector<8x128xf32>
    %18 = arith.addf %12, %17 : vector<8x128xf32>
    %19 = vector.extract_strided_slice %1 {offsets = [0, 3], sizes = [8, 1], strides = [1, 1]} : vector<8x8xf32> to vector<8x1xf32>
    %20 = vector.extract_strided_slice %0 {offsets = [3, 0], sizes = [1, 128], strides = [1, 1]} : vector<8x128xf32> to vector<1x128xf32>
    %21 = vector.broadcast %19 : vector<8x1xf32> to vector<8x128xf32>
    %22 = vector.broadcast %20 : vector<1x128xf32> to vector<8x128xf32>
    %23 = arith.mulf %21, %22 : vector<8x128xf32>
    %24 = arith.addf %18, %23 : vector<8x128xf32>
    %25 = vector.extract_strided_slice %1 {offsets = [0, 4], sizes = [8, 1], strides = [1, 1]} : vector<8x8xf32> to vector<8x1xf32>
    %26 = vector.extract_strided_slice %0 {offsets = [4, 0], sizes = [1, 128], strides = [1, 1]} : vector<8x128xf32> to vector<1x128xf32>
    %27 = vector.broadcast %25 : vector<8x1xf32> to vector<8x128xf32>
    %28 = vector.broadcast %26 : vector<1x128xf32> to vector<8x128xf32>
    %29 = arith.mulf %27, %28 : vector<8x128xf32>
    %30 = arith.addf %24, %29 : vector<8x128xf32>
    %31 = vector.extract_strided_slice %1 {offsets = [0, 5], sizes = [8, 1], strides = [1, 1]} : vector<8x8xf32> to vector<8x1xf32>
    %32 = vector.extract_strided_slice %0 {offsets = [5, 0], sizes = [1, 128], strides = [1, 1]} : vector<8x128xf32> to vector<1x128xf32>
    %33 = vector.broadcast %31 : vector<8x1xf32> to vector<8x128xf32>
    %34 = vector.broadcast %32 : vector<1x128xf32> to vector<8x128xf32>
    %35 = arith.mulf %33, %34 : vector<8x128xf32>
    %36 = arith.addf %30, %35 : vector<8x128xf32>
    %37 = vector.extract_strided_slice %1 {offsets = [0, 6], sizes = [8, 1], strides = [1, 1]} : vector<8x8xf32> to vector<8x1xf32>
    %38 = vector.extract_strided_slice %0 {offsets = [6, 0], sizes = [1, 128], strides = [1, 1]} : vector<8x128xf32> to vector<1x128xf32>
    %39 = vector.broadcast %37 : vector<8x1xf32> to vector<8x128xf32>
    %40 = vector.broadcast %38 : vector<1x128xf32> to vector<8x128xf32>
    %41 = arith.mulf %39, %40 : vector<8x128xf32>
    %42 = arith.addf %36, %41 : vector<8x128xf32>
    %43 = vector.extract_strided_slice %1 {offsets = [0, 7], sizes = [8, 1], strides = [1, 1]} : vector<8x8xf32> to vector<8x1xf32>
    %44 = vector.extract_strided_slice %0 {offsets = [7, 0], sizes = [1, 128], strides = [1, 1]} : vector<8x128xf32> to vector<1x128xf32>
    %45 = vector.broadcast %43 : vector<8x1xf32> to vector<8x128xf32>
    %46 = vector.broadcast %44 : vector<1x128xf32> to vector<8x128xf32>
    %47 = arith.mulf %45, %46 : vector<8x128xf32>
    %48 = arith.addf %42, %47 : vector<8x128xf32>
    %49 = arith.addf %0, %48 : vector<8x128xf32>
    %c0_3 = arith.constant 0 : index
    %c0_4 = arith.constant 0 : index
    %50 = vector.load %arg4[%c0_3, %c0_4] : memref<8x1xf32, #tpu.memory_space<vmem>>, vector<8x1xf32>
    %51 = vector.broadcast %50 : vector<8x1xf32> to vector<8x128xf32>
    %52 = arith.addf %49, %51 : vector<8x128xf32>
    %c0_5 = arith.constant 0 : index
    %c0_6 = arith.constant 0 : index
    %53 = vector.load %arg5[%c0_5, %c0_6] : memref<8x128xf32, #tpu.memory_space<vmem>>, vector<8x128xf32>
    tpu.vector_store %arg5[%c0_5, %c0_6], %52 {strides = array<i32>} : memref<8x128xf32, #tpu.memory_space<vmem>>, vector<8x128xf32>,
    return
  }
  func.func @transform_0(%arg0: i32, %arg1: i32) -> (i32, i32) {
    %c0_i32 = arith.constant 0 : i32
    return %arg0, %arg1 : i32, i32
  }
  func.func @transform_1(%arg0: i32, %arg1: i32) -> (i32, i32) {
    %c0_i32 = arith.constant 0 : i32
    %c0_i32_0 = arith.constant 0 : i32
    return %arg0, %c0_i32 : i32, i32
  }
  func.func @transform_2(%arg0: i32, %arg1: i32) -> (i32, i32) {
    %c0_i32 = arith.constant 0 : i32
    %c0_i32_0 = arith.constant 0 : i32
    return %arg0, %c0_i32 : i32, i32
  }
  func.func @transform_3(%arg0: i32, %arg1: i32) -> (i32, i32) {
    %c0_i32 = arith.constant 0 : i32
    return %arg0, %arg1 : i32, i32
  }
}

</mosaic_0001>

<bundles_post_ra>
// kernel: iddpm_precond.1
= control target key start
LH: loop header
LB: loop body
LE: loop exit
PB: predicated region body
PF: predicated region fallthrough
CT: control target
= control target key end

     0   :  { %s521_s12 = smov 0   ;;  %s523_s13 = smov 0   ;;  %s571_s0 = inlined_call_operand.vmem [shape: f32[8,256], index: 0, kind: input, shape index: {}]   ;;  %s572_s1 = inlined_call_operand.vmem [shape: f32[8,8], index: 1, kind: input, shape index: {}]   ;;  %s573_s2 = inlined_call_operand.vmem [shape: f32[8,1], index: 2, kind: input, shape index: {}]   ;;  %s574_s3 = inlined_call_operand.vmem [shape: f32[8,256], index: 3, kind: output, shape index: {}]  }
   0x1   :  { %s525_s14 = smov 0  }
   0x2 LB: > { %s22_s15 = sadd.s32 1, %s487_s13  ;;  %p423_p0 = scmp.ge.s32.totalorder %s491_s14, 1  ;;  %s491_s14 = sphi %s525_s14, %s13_s14   ;;  %s487_s13 = sphi %s523_s13, %s576_s13   ;;  %s483_s12 = sphi %s521_s12, %s575_s12  }
   0x3   : > { %p23_p1 = scmp.ge.s32.totalorder %s22_s15, 2  ;;  %p174_p2 = scmp.lt.s32.totalorder %s491_s14, 3 }
   0x5   : > { %s578_s15 = smov (%p23_p1, %s22_s15), 0  ;;  %p175_p3 = pnand %p423_p0, %p174_p2 }
   0x6   : > { %p214_p4 = scmp.lt.s32.totalorder (!%p175_p3), %s483_s12, 1 }
   0x7   : > { %178 = sbr.rel (%p175_p3) target bundleno = 159 (0x9f), region = 32 }
   0xc   : > { %v237_v0 = vld [vmem:[%s572_s1] sm:$0xff]  ;;  %v493_v1 = vmov 0   ;;  %v494_v2 = vmov 2   ;;  %v495_v3 = vmov 4   ;;  %v496_v4 = vmov 1   ;;  %s580_s12 = smov (!%p214_p4, %s483_s12), 1 }
   0xd   : > { %460 = vset.pattern.permute.xlu0 %v493_v1  ;;  %462 = vset.pattern.permute.xlu1 %v494_v2  ;;  %v497_v5 = vmov 3   ;;  %v498_v6 = vmov 5   ;;  %v295_v7 = vld [vmem:[%s573_s2] sm:$0xff]  ;;  %v499_v8 = vmov 6   ;;  %v500_v9 = vmov 7   ;;  %s424_s20 = sshll.u32 %s580_s12, 3 }
   0xe   : > { %240 = vperm.xlu0 %460, %v237_v0   ;;  %253 = vperm.xlu1 %462, %v237_v0   ;;  %s219_s23 = scalar_lea.vmem %s571_s0, %s424_s20  ;;  %s235_s26 = scalar_lea.vmem %s574_s3, %s424_s20 }
   0xf   : > { %464 = vset.pattern.permute.xlu2 %v495_v3  ;;  %v236_v13 = vld [vmem:[%s219_s23] sm:$0xff] }
  0x10   : > { %267 = vperm.xlu2 %464, %v237_v0   ;;  %v243_v14 = vperm.slane %v236_v13, 0  ;;  %v249_v15 = vperm.slane %v236_v13, 1  ;;  %v256_v17 = vperm.slane %v236_v13, 2  ;;  %v263_v22 = vperm.slane %v236_v13, 3 }
  0x11   : > { %v270_v24 = vperm.slane %v236_v13, 4  ;;  %v277_v28 = vperm.slane %v236_v13, 5  ;;  %v284_v29 = vperm.slane %v236_v13, 6  ;;  %v291_v32 = vperm.slane %v236_v13, 7 }
  0x16   : > { %461 = vset.pattern.permute.xlu0 %v496_v4  ;;  %463 = vset.pattern.permute.xlu1 %v497_v5 }
  0x17   : > { %246 = vperm.xlu0 %461, %v237_v0   ;;  %260 = vperm.xlu1 %463, %v237_v0  }
  0x18   : > { %465 = vset.pattern.permute.xlu2 %v498_v6 }
  0x19   : > { %274 = vperm.xlu2 %465, %v237_v0  }
  0x1f   : > { %466 = vset.pattern.permute.xlu1 %v499_v8  ;;  %468 = vset.pattern.permute.xlu0 %v493_v1 }
  0x20   : > { %281 = vperm.xlu1 %466, %v237_v0   ;;  %298 = vperm.xlu0 %468, %v295_v7  }
  0x21   : > { %467 = vset.pattern.permute.xlu2 %v500_v9 }
  0x22   : > { %288 = vperm.xlu2 %467, %v237_v0  }
  0x6a   : > { %v268_v10 = vpop.permute.xlu2 %267 }
  0x6b   : > { %v271_v30 = vmul.f32 %v270_v24, %v268_v10 }
  0x73   : > { %v275_v16 = vpop.permute.xlu2 %274 }
  0x74   : > { %v278_v35 = vmul.f32 %v277_v28, %v275_v16 }
  0x7c   : > { %v289_v33 = vpop.permute.xlu2 %288 }
  0x7d   : > { %v292_v39 = vmul.f32 %v291_v32, %v289_v33 }
  0x80   : > { %v241_v11 = vpop.permute.xlu0 %240  ;;  %v254_v12 = vpop.permute.xlu1 %253 }
  0x81   : > { %v244_v20 = vmul.f32 %v243_v14, %v241_v11  ;;  %v257_v23 = vmul.f32 %v256_v17, %v254_v12 }
  0x89   : > { %v247_v18 = vpop.permute.xlu0 %246  ;;  %v261_v19 = vpop.permute.xlu1 %260 }
  0x8a   : > { %v250_v21 = vmul.f32 %v249_v15, %v247_v18  ;;  %v264_v27 = vmul.f32 %v263_v22, %v261_v19 }
  0x8c   : > { %v251_v25 = vadd.f32 %v250_v21, %v244_v20 }
  0x8e   : > { %v258_v26 = vadd.f32 %v257_v23, %v251_v25 }
  0x90   : > { %v265_v31 = vadd.f32 %v264_v27, %v258_v26 }
  0x92   : > { %v272_v34 = vadd.f32 %v271_v30, %v265_v31  ;;  %v282_v36 = vpop.permute.xlu1 %281  ;;  %v299_v42 = vpop.permute.xlu0 %298 }
  0x93   : > { %v285_v37 = vmul.f32 %v284_v29, %v282_v36 }
  0x94   : > { %v279_v38 = vadd.f32 %v278_v35, %v272_v34 }
  0x96   : > { %v286_v40 = vadd.f32 %v285_v37, %v279_v38 }
  0x98   : > { %v293_v41 = vadd.f32 %v292_v39, %v286_v40 }
  0x9a   : > { %v294_v43 = vadd.f32 %v293_v41, %v236_v13 }
  0x9c   : > { %v301_v44 = vadd.f32 %v299_v42, %v294_v43 }
  0x9e   : > { %302 = vst [vmem:[%s235_s26] sm:$0xff] %v301_v44 }
  0x9f PF: > { %s13_s14 = sadd.s32 1, %s491_s14   ;;  %s575_s12 = smov %s487_s13 }
  0xa0   : > { %p10_p5 = scmp.ge.s32.totalorder %s13_s14, 4   ;;  %s576_s13 = smov %s578_s15 }
  0xa2   :  { %12 = sbr.rel (!%p10_p5) target bundleno = 2 (0x2), region = 68 }

</bundles_post_ra>
